<compile_context>
chip_gen: v6e
topology: v6e:2x2x1
jax: 0.10.0
libtpu: 0.0.40
codegen_flags: <defaults>
</compile_context>

<pallas_src>
import jax
import jax.numpy as jnp
from jax import lax
from jax.experimental import pallas as pl
from jax.experimental.pallas import tpu as pltpu

_EPS = 1e-5

_COMPILER_PARAMS = pltpu.CompilerParams(
    dimension_semantics=("parallel",),       # shards the row grid across TCs (v7x)
    vmem_limit_bytes=32 * 1024 * 1024,       # explicit scoped-VMEM limit
)


# ---------------------------------------------------------------------------
# Pallas kernels
# ---------------------------------------------------------------------------
def conv_stats_kernel(x_ref, w_ref, y_ref, stats_ref):
    """Strided Conv1d as a patch matmul + per-tile partial BN statistics.

    x_ref:     (TN, K)  patch rows, K = window * C, flattened (k, c)
    w_ref:     (K, C)   conv weight rearranged so Wf[k*C + ci, co] = W[co, ci, k]
    y_ref:     (TN, C)  conv output (f32; no bias -- it cancels in BatchNorm)
    stats_ref: (1, 2, C) this tile's [sum(y), sum(y*y)] (finalized in JAX)
    """
    y = jnp.dot(x_ref[...], w_ref[...], preferred_element_type=jnp.float32)
    y_ref[...] = y
    # Two *independent* reductions (no data dep) -> better XLU overlap.
    ssum = jnp.sum(y, axis=0, keepdims=True)
    ssq = jnp.sum(y * y, axis=0, keepdims=True)
    stats_ref[...] = jnp.concatenate([ssum, ssq], axis=0).reshape(1, 2, -1)


def bn_elu_ln_kernel(y_ref, scale_ref, shift_ref, g_ref, b_ref, e_ref, ln_ref):
    """Apply BatchNorm (precomputed scale/shift) + ELU, with fused row LayerNorm.

    e_ref : BN+ELU output (feeds the next ConvLayer).
    ln_ref: LayerNorm(e) -- this stage's rows of the final output.
    """
    z = y_ref[...] * scale_ref[...] + shift_ref[...]
    e = jnp.where(z > 0, z, jnp.expm1(jnp.minimum(z, 0.0)))  # ELU(alpha=1)
    e_ref[...] = e
    inv_c = 1.0 / e.shape[-1]
    mean = jnp.sum(e, axis=-1, keepdims=True) * inv_c
    ex2 = jnp.sum(e * e, axis=-1, keepdims=True) * inv_c
    var = jnp.maximum(ex2 - mean * mean, 0.0)
    ln_ref[...] = (e - mean) * lax.rsqrt(var + _EPS) * g_ref[...] + b_ref[...]


def layernorm_kernel(x_ref, g_ref, b_ref, o_ref):
    """Row-tiled LayerNorm over the trailing d_model axis (biased var, eps=1e-5)."""
    x = x_ref[...]
    inv_c = 1.0 / x.shape[-1]
    mean = jnp.sum(x, axis=-1, keepdims=True) * inv_c
    ex2 = jnp.sum(x * x, axis=-1, keepdims=True) * inv_c
    var = jnp.maximum(ex2 - mean * mean, 0.0)
    o_ref[...] = (x - mean) * lax.rsqrt(var + _EPS) * g_ref[...] + b_ref[...]


# ---------------------------------------------------------------------------
# Tiling helpers
# ---------------------------------------------------------------------------
def _round_up(n, m):
    return (n + m - 1) // m * m


def _pick_tile_rows(n_rows, per_row_bytes, max_rows=512, budget_bytes=8 << 20):
    """Row-tile size: multiple of 8, <= max_rows, double-buffered fits budget."""
    cap = min(max_rows, _round_up(n_rows, 8))
    fit = max(8, (budget_bytes // max(per_row_bytes, 1) // 2) // 8 * 8)
    return max(8, min(cap, fit))


def _pad_rows(x2d, n_pad):
    n = x2d.shape[0]
    if n_pad == n:
        return x2d
    return jnp.pad(x2d, ((0, n_pad - n), (0, 0)))


# ---------------------------------------------------------------------------
# Wrappers
# ---------------------------------------------------------------------------
def _conv_matmul_stats(patches, Wf, tn):
    """Tiled conv-as-matmul; returns (y, per-tile [sum, sumsq]) -- both f32."""
    Np, K = patches.shape
    C = Wf.shape[1]
    n_tiles = Np // tn
    itemsize = patches.dtype.itemsize
    cost = pl.CostEstimate(
        flops=2 * Np * K * C,
        transcendentals=0,
        bytes_accessed=Np * K * itemsize + K * C * itemsize
        + Np * C * 4 + n_tiles * 2 * C * 4,
    )
    return pl.pallas_call(
        conv_stats_kernel,
        out_shape=(
            jax.ShapeDtypeStruct((Np, C), jnp.float32),
            jax.ShapeDtypeStruct((n_tiles, 2, C), jnp.float32),
        ),
        grid=(n_tiles,),
        in_specs=[
            pl.BlockSpec((tn, K), lambda i: (i, 0)),
            pl.BlockSpec((K, C), lambda i: (0, 0)),       # pinned, resident
        ],
        out_specs=(
            pl.BlockSpec((tn, C), lambda i: (i, 0)),
            pl.BlockSpec((1, 2, C), lambda i: (i, 0, 0)),
        ),
        compiler_params=_COMPILER_PARAMS,
        cost_estimate=cost,
    )(patches, Wf)


def _bn_elu_ln(y, scale, shift, ln_w, ln_b, tn):
    """Tiled BN-apply + ELU with fused LayerNorm.  Returns (elu_out, ln_out)."""
    Np, C = y.shape
    n_tiles = Np // tn
    vec = pl.BlockSpec((1, C), lambda i: (0, 0))
    return pl.pallas_call(
        bn_elu_ln_kernel,
        out_shape=(
            jax.ShapeDtypeStruct((Np, C), jnp.float32),
            jax.ShapeDtypeStruct((Np, C), jnp.float32),
        ),
        grid=(n_tiles,),
        in_specs=[pl.BlockSpec((tn, C), lambda i: (i, 0)), vec, vec, vec, vec],
        out_specs=(
            pl.BlockSpec((tn, C), lambda i: (i, 0)),
            pl.BlockSpec((tn, C), lambda i: (i, 0)),
        ),
        compiler_params=_COMPILER_PARAMS,
    )(y, scale.reshape(1, C), shift.reshape(1, C),
      ln_w.reshape(1, C), ln_b.reshape(1, C))


def _layer_norm_rows(x2d, g, b):
    """Row-tiled LayerNorm over the last axis of a (N, C) tensor."""
    N, C = x2d.shape
    tn = _pick_tile_rows(N, 2 * C * 4)
    Np = _round_up(N, tn)
    xp = _pad_rows(x2d, Np)
    vec = pl.BlockSpec((1, C), lambda i: (0, 0))
    out = pl.pallas_call(
        layernorm_kernel,
        out_shape=jax.ShapeDtypeStruct((Np, C), jnp.float32),
        grid=(Np // tn,),
        in_specs=[pl.BlockSpec((tn, C), lambda i: (i, 0)), vec, vec],
        out_specs=pl.BlockSpec((tn, C), lambda i: (i, 0)),
        compiler_params=_COMPILER_PARAMS,
    )(xp, g.reshape(1, C), b.reshape(1, C))
    return out[:N]


def conv_construct(enc_input, params, window, use_bf16_matmul=False):
    """Pallas implementation of Conv_Construct.forward.

    enc_input: (B, L, d_model) -> (B, L + L/w + L/w^2 + L/w^3, d_model)
    use_bf16_matmul: cast patches / conv weight to bf16 for the MXU (v6e/v7x);
                     BN/LN statistics stay in f32.
    """
    B, L, C = enc_input.shape
    ln_w, ln_b = params["ln_w"], params["ln_b"]

    # Segment 0: LayerNorm of the raw input rows (written pre-normalized, so the
    # concatenated pre-LN tensor is never materialized).
    ln_segments = [_layer_norm_rows(enc_input.reshape(B * L, C), ln_w, ln_b)
                   .reshape(B, L, C)]

    x = enc_input
    for (W, _b_unused, g, beta) in params["convs"]:
        # NOTE: conv bias is intentionally dropped -- it cancels in BatchNorm.
        Bx, Lx, _ = x.shape
        Lout = Lx // window
        K = window * C
        N = Bx * Lout

        patches = x[:, : Lout * window, :].reshape(N, K)
        Wf = jnp.transpose(W, (2, 1, 0)).reshape(K, C)
        if use_bf16_matmul:
            patches = patches.astype(jnp.bfloat16)
            Wf = Wf.astype(jnp.bfloat16)

        tn = _pick_tile_rows(N, (K + 3 * C) * 4)
        Np = _round_up(N, tn)
        patches = _pad_rows(patches, Np)  # zero rows contribute 0 to the stats

        # Pass 1: conv-as-matmul + per-tile partial sums.
        y, partial = _conv_matmul_stats(patches, Wf, tn)

        # Finalize *global* BN batch statistics (biased var, eps=1e-5) in JAX
        # (tiny: n_tiles x 2 x C), dividing by the real row count N.
        ssum = jnp.sum(partial[:, 0, :], axis=0)
        ssq = jnp.sum(partial[:, 1, :], axis=0)
        mean = ssum / N
        var = jnp.maximum(ssq / N - mean * mean, 0.0)
        scale = g * lax.rsqrt(var + _EPS)
        shift = beta - mean * scale

        # Pass 2: BN-apply + ELU fused with this stage's LayerNorm rows.
        e, ln_e = _bn_elu_ln(y, scale, shift, ln_w, ln_b, tn)
        x = e[:N].reshape(Bx, Lout, C)
        ln_segments.append(ln_e[:N].reshape(Bx, Lout, C))

    # Final assembly: cat(dim=2).transpose(1,2) of the reference == concat on
    # the length axis of already-LayerNormed, channels-last segments.
    return jnp.concatenate(ln_segments, axis=1)


# ---------------------------------------------------------------------------
# Pure-JAX reference (keeps the conv bias and two-step variance)
# ---------------------------------------------------------------------------
def conv_construct_ref(enc_input, params, window):
    x = enc_input
    outs = [x]
    for (W, b, g, beta) in params["convs"]:
        B, L, C = x.shape
        Lout = L // window
        patches = x[:, : Lout * window, :].reshape(B, Lout, window, C)
        y = jnp.einsum("blkc,ock->blo", patches, W) + b
        mean = y.mean(axis=(0, 1))
        var = ((y - mean) ** 2).mean(axis=(0, 1))
        z = (y - mean) / jnp.sqrt(var + _EPS) * g + beta
        x = jnp.where(z > 0, z, jnp.expm1(jnp.minimum(z, 0.0)))
        outs.append(x)
    cat = jnp.concatenate(outs, axis=1)
    mean = cat.mean(-1, keepdims=True)
    var = ((cat - mean) ** 2).mean(-1, keepdims=True)
    return (cat - mean) / jnp.sqrt(var + _EPS) * params["ln_w"] + params["ln_b"]


# ---------------------------------------------------------------------------
if __name__ == "__main__":
    B, L, d_model = 2, 16, 32
    window_size = 2
    d_inner = 64  # unused by Conv_Construct.forward (matches reference module)

    key = jax.random.PRNGKey(0)
    keys = jax.random.split(key, 1 + 4 * 3 + 2)

    convs = []
    kidx = 1
    for _ in range(3):
        W = 0.1 * jax.random.normal(keys[kidx], (d_model, d_model, window_size),
                                    dtype=jnp.float32); kidx += 1
        b = 0.05 * jax.random.normal(keys[kidx], (d_model,), dtype=jnp.float32); kidx += 1
        g = 1.0 + 0.1 * jax.random.normal(keys[kidx], (d_model,), dtype=jnp.float32); kidx += 1
        beta = 0.1 * jax.random.normal(keys[kidx], (d_model,), dtype=jnp.float32); kidx += 1
        convs.append((W, b, g, beta))
    ln_w = 1.0 + 0.1 * jax.random.normal(keys[kidx], (d_model,), dtype=jnp.float32); kidx += 1
    ln_b = 0.1 * jax.random.normal(keys[kidx], (d_model,), dtype=jnp.float32)
    params = {"convs": convs, "ln_w": ln_w, "ln_b": ln_b}

    enc_input = jax.random.normal(keys[0], (B, L, d_model), dtype=jnp.float32)

    # f32 matmul path here for a tight numerical check; set use_bf16_matmul=True
    # on v6e/v7x for 2x MXU throughput + halved patch/weight DMA bytes.
    out = conv_construct(enc_input, params, window_size, use_bf16_matmul=False)
    out = jax.block_until_ready(out)

    expected_len = (L + L // window_size + L // window_size**2
                    + L // window_size**3)
    assert out.shape == (B, expected_len, d_model), out.shape

    ref = conv_construct_ref(enc_input, params, window_size)
    err = float(jnp.max(jnp.abs(out - ref)))
    assert jnp.allclose(out, ref, atol=2e-4, rtol=2e-4), err

    print("KERNEL_OK")
</pallas_src>

<mosaic_0001>
module attributes {stable_mosaic.version = 11 : i64} {
  func.func @layernorm_kernel(%arg0: i32, %arg1: memref<32x32xf32, #tpu.memory_space<vmem>>, %arg2: memref<1x32xf32, #tpu.memory_space<vmem>>, %arg3: memref<1x32xf32, #tpu.memory_space<vmem>>, %arg4: memref<32x32xf32, #tpu.memory_space<vmem>>) attributes {dimension_semantics = [#tpu.dimension_semantics<parallel>], iteration_bounds = array<i64: 1>, scalar_prefetch = 0 : i64, scratch_operands = 0 : i64, tpu.core_type = #tpu.core_type<tc>, window_params = [{transform_indices = @transform_0, window_bounds = array<i64: 32, 32>}, {pipeline_mode = #tpu.pipeline_mode<synchronous>, transform_indices = @transform_1, window_bounds = array<i64: 1, 32>}, {pipeline_mode = #tpu.pipeline_mode<synchronous>, transform_indices = @transform_2, window_bounds = array<i64: 1, 32>}, {transform_indices = @transform_3, window_bounds = array<i64: 32, 32>}]} {
    %c0 = arith.constant 0 : index
    %c0_0 = arith.constant 0 : index
    %0 = vector.load %arg1[%c0, %c0_0] : memref<32x32xf32, #tpu.memory_space<vmem>>, vector<32x32xf32>
    %cst = arith.constant dense<0.000000e+00> : vector<32xf32>
    %1 = vector.multi_reduction <add>, %0, %cst [1] : vector<32x32xf32> to vector<32xf32>
    %2 = vector.shape_cast %1 : vector<32xf32> to vector<32x1xf32>
    %cst_1 = arith.constant 3.125000e-02 : f32
    %3 = vector.broadcast %cst_1 : f32 to vector<32x1xf32>
    %4 = arith.mulf %2, %3 : vector<32x1xf32>
    %5 = arith.mulf %0, %0 : vector<32x32xf32>
    %cst_2 = arith.constant dense<0.000000e+00> : vector<32xf32>
    %6 = vector.multi_reduction <add>, %5, %cst_2 [1] : vector<32x32xf32> to vector<32xf32>
    %7 = vector.shape_cast %6 : vector<32xf32> to vector<32x1xf32>
    %cst_3 = arith.constant 3.125000e-02 : f32
    %8 = vector.broadcast %cst_3 : f32 to vector<32x1xf32>
    %9 = arith.mulf %7, %8 : vector<32x1xf32>
    %10 = arith.mulf %4, %4 : vector<32x1xf32>
    %11 = arith.subf %9, %10 : vector<32x1xf32>
    %cst_4 = arith.constant 0.000000e+00 : f32
    %12 = vector.broadcast %cst_4 : f32 to vector<32x1xf32>
    %13 = arith.maximumf %11, %12 : vector<32x1xf32>
    %14 = vector.broadcast %4 : vector<32x1xf32> to vector<32x32xf32>
    %15 = arith.subf %0, %14 : vector<32x32xf32>
    %cst_5 = arith.constant 9.99999974E-6 : f32
    %16 = vector.broadcast %cst_5 : f32 to vector<32x1xf32>
    %17 = arith.addf %13, %16 : vector<32x1xf32>
    %18 = math.rsqrt %17 : vector<32x1xf32>
    %19 = vector.broadcast %18 : vector<32x1xf32> to vector<32x32xf32>
    %20 = arith.mulf %15, %19 : vector<32x32xf32>
    %c0_6 = arith.constant 0 : index
    %c0_7 = arith.constant 0 : index
    %21 = vector.load %arg2[%c0_6, %c0_7] : memref<1x32xf32, #tpu.memory_space<vmem>>, vector<1x32xf32>
    %22 = vector.broadcast %21 : vector<1x32xf32> to vector<32x32xf32>
    %23 = arith.mulf %20, %22 : vector<32x32xf32>
    %c0_8 = arith.constant 0 : index
    %c0_9 = arith.constant 0 : index
    %24 = vector.load %arg3[%c0_8, %c0_9] : memref<1x32xf32, #tpu.memory_space<vmem>>, vector<1x32xf32>
    %25 = vector.broadcast %24 : vector<1x32xf32> to vector<32x32xf32>
    %26 = arith.addf %23, %25 : vector<32x32xf32>
    %c0_10 = arith.constant 0 : index
    %c0_11 = arith.constant 0 : index
    %27 = vector.load %arg4[%c0_10, %c0_11] : memref<32x32xf32, #tpu.memory_space<vmem>>, vector<32x32xf32>
    tpu.vector_store %arg4[%c0_10, %c0_11], %26 {strides = array<i32>} : memref<32x32xf32, #tpu.memory_space<vmem>>, vector<32x32xf32>,
    return
  }
  func.func @transform_0(%arg0: i32) -> (i32, i32) {
    %c0_i32 = arith.constant 0 : i32
    %c0_i32_0 = arith.constant 0 : i32
    return %arg0, %c0_i32 : i32, i32
  }
  func.func @transform_1(%arg0: i32) -> (i32, i32) {
    %c0_i32 = arith.constant 0 : i32
    %c0_i32_0 = arith.constant 0 : i32
    %c0_i32_1 = arith.constant 0 : i32
    return %c0_i32, %c0_i32_0 : i32, i32
  }
  func.func @transform_2(%arg0: i32) -> (i32, i32) {
    %c0_i32 = arith.constant 0 : i32
    %c0_i32_0 = arith.constant 0 : i32
    %c0_i32_1 = arith.constant 0 : i32
    return %c0_i32, %c0_i32_0 : i32, i32
  }
  func.func @transform_3(%arg0: i32) -> (i32, i32) {
    %c0_i32 = arith.constant 0 : i32
    %c0_i32_0 = arith.constant 0 : i32
    return %arg0, %c0_i32 : i32, i32
  }
}

</mosaic_0001>

<bundles_post_ra>
// kernel: tpu_custom_call.1
= control target key start
LH: loop header
LB: loop body
LE: loop exit
PB: predicated region body
PF: predicated region fallthrough
CT: control target
= control target key end

     0   :  { %8 = vsyncpa [#allocation3], 0  ;;  %s271_s0 = inlined_call_operand.hbm [shape: f32[32,32], index: 0, kind: input, shape index: {}]   ;;  %s272_s1 = inlined_call_operand.vmem [shape: f32[1,32], index: 1, kind: input, shape index: {}]   ;;  %s273_s2 = inlined_call_operand.vmem [shape: f32[1,32], index: 2, kind: input, shape index: {}]   ;;  %s274_s3 = inlined_call_operand.hbm [shape: f32[32,32], index: 3, kind: output, shape index: {}]  }
   0x1   :  { %9 = vsyncpa [#allocation4], 0  ;;  %s199_s12 = smov [#allocation2]  }
   0x2   :  { %s15_s13 = sshll.u32 %s199_s12, 4  ;;  %s16_s13 = int_to_ptr.vmem [resolvable:$true] %s15_s13 }
   0x3   :  { %s163_s14 = scalar_lea.vmem %s16_s13, 512  ;;  %p168_p1 = scmp.lt.s32.totalorder %s16_s13, %s16_s13 }
   0x4   :  { %p164_p0 = scmp.ne.s32.totalorder %s16_s13, %s163_s14  ;;  %p169_p2 = scmp.lt.s32.totalorder %s163_s14, %s163_s14 }
   0x6   :  { %p170_p3 = por %p169_p2, %p168_p1 }
   0x8   :  { %p171_p4 = pnand %p170_p3, %p164_p0 }
   0xa   :  { %174 = shalt.err (!%p171_p4)
}
   0xb   :  { %s200_s15 = smov 128   ;;  %s201_s16 = smov 8  }
   0xc   :  { %21 = dma.hbm_to_vmem [thread:$0]  %s271_s0, 512, %s16_s13, [#allocation3], %s200_s15, %s200_s15, %s201_s16  }
   0xd   :  { %195 = dma.done.wait [#allocation3], 512  }
   0xe   :  { %196 = vsyncadd [#allocation3], 4294966784  ;;  %vm33_vm0 = vcmask 261120   ;;  %v229_v0 = vld [vmem:[#allocation2 + $0x10] sm:$0xff]  ;;  %v231_v1 = vld [vmem:[#allocation2] sm:$0xff] }
   0xf   :  { %v233_v2 = vld [vmem:[#allocation2 + $0x18] sm:$0xff]  ;;  %v40_v3 = vsel %vm33_vm0, %v229_v0, 0.0  ;;  %v34_v4 = vsel %vm33_vm0, %v231_v1, 0.0  ;;  %v30_v5 = vld [vmem:[#allocation2 + $0x8] sm:$0xff]  ;;  %v50_v9 = vmul.f32 %v231_v1, %v231_v1  ;;  %v52_v13 = vmul.f32 %v229_v0, %v229_v0  ;;  %v141_v51 = vld [vmem:[%s272_s1] ss:$0 sm:$0xff] }
  0x10   :  { %41 = vadd.xlane.f32.xlu1 %v40_v3  ;;  %35 = vadd.xlane.f32.xlu0 %v34_v4  ;;  %v43_v6 = vsel %vm33_vm0, %v233_v2, 0.0  ;;  %v37_v7 = vsel %vm33_vm0, %v30_v5, 0.0  ;;  %v51_v8 = vmul.f32 %v30_v5, %v30_v5  ;;  %v53_v12 = vmul.f32 %v233_v2, %v233_v2  ;;  %v142_v55 = vld [vmem:[%s273_s2] ss:$0 sm:$0xff]  ;;  %s202_s1 = smov [#allocation5]  }
  0x11   :  { %v54_v11 = vsel %vm33_vm0, %v50_v9, 0.0  ;;  %v60_v15 = vsel %vm33_vm0, %v52_v13, 0.0  ;;  %s129_s22 = sshll.u32 %s202_s1, 4  ;;  %s130_s22 = int_to_ptr.vmem [resolvable:$true] %s129_s22 }
  0x12   :  { %v57_v10 = vsel %vm33_vm0, %v51_v8, 0.0  ;;  %v63_v14 = vsel %vm33_vm0, %v53_v12, 0.0  ;;  %s175_s2 = scalar_lea.vmem %s130_s22, 512  ;;  %p180_p6 = scmp.lt.s32.totalorder %s130_s22, %s130_s22 }
  0x13   :  { %p176_p5 = scmp.ne.s32.totalorder %s130_s22, %s175_s2  ;;  %p181_p7 = scmp.lt.s32.totalorder %s175_s2, %s175_s2 }
  0x14   :  { %44 = vadd.xlane.f32.xlu1 %v43_v6  ;;  %38 = vadd.xlane.f32.xlu0 %v37_v7 }
  0x15   :  { %p182_p8 = por %p181_p7, %p180_p6 }
  0x17   :  { %p183_p9 = pnand %p182_p8, %p176_p5 }
  0x18   :  { %58 = vadd.xlane.f32.xlu1 %v57_v10  ;;  %55 = vadd.xlane.f32.xlu0 %v54_v11 }
  0x1c   :  { %64 = vadd.xlane.f32.xlu1 %v63_v14  ;;  %61 = vadd.xlane.f32.xlu0 %v60_v15 }
  0x99   :  { %v42_v16 = vpop.xlane.xlu1 %41  ;;  %v36_v17 = vpop.xlane.xlu0 %35 }
  0x9a   :  { %v46_v20 = vmul.f32 0.03125, %v36_v17  ;;  %v48_v22 = vmul.f32 0.03125, %v42_v16 }
  0x9c   :  { %v70_v26 = vmul.f32 %v46_v20, %v46_v20  ;;  %v72_v32 = vmul.f32 %v48_v22, %v48_v22  ;;  %v82_v50 = vsub.f32 %v231_v1, %v46_v20  ;;  %v84_v59 = vsub.f32 %v229_v0, %v48_v22 }
  0x9d   :  { %v45_v18 = vpop.xlane.xlu1 %44  ;;  %v39_v19 = vpop.xlane.xlu0 %38 }
  0x9e   :  { %v47_v21 = vmul.f32 0.03125, %v39_v19  ;;  %v49_v23 = vmul.f32 0.03125, %v45_v18 }
  0xa0   :  { %v71_v27 = vmul.f32 %v47_v21, %v47_v21  ;;  %v73_v33 = vmul.f32 %v49_v23, %v49_v23  ;;  %v83_v48 = vsub.f32 %v30_v5, %v47_v21  ;;  %v85_v56 = vsub.f32 %v233_v2, %v49_v23 }
  0xa1   :  { %v59_v24 = vpop.xlane.xlu1 %58  ;;  %v56_v25 = vpop.xlane.xlu0 %55 }
  0xa2   :  { %v67_v28 = vmul.f32 0.03125, %v59_v24  ;;  %v66_v29 = vmul.f32 0.03125, %v56_v25 }
  0xa4   :  { %v75_v30 = vsub.f32 %v67_v28, %v71_v27  ;;  %v74_v31 = vsub.f32 %v66_v29, %v70_v26 }
  0xa5   :  { %v65_v34 = vpop.xlane.xlu1 %64  ;;  %v62_v35 = vpop.xlane.xlu0 %61 }
  0xa6   :  { %v79_v36 = vmax.f32 %v75_v30, 0.0  ;;  %v78_v37 = vmax.f32 %v74_v31, 0.0  ;;  %v69_v38 = vmul.f32 0.03125, %v65_v34  ;;  %v68_v39 = vmul.f32 0.03125, %v62_v35 }
  0xa8   :  { %v87_v40 = vadd.f32 1e-05, %v79_v36  ;;  %v86_v41 = vadd.f32 1e-05, %v78_v37  ;;  %v77_v42 = vsub.f32 %v69_v38, %v73_v33  ;;  %v76_v43 = vsub.f32 %v68_v39, %v72_v32 }
  0xaa   :  { %147 = vrsqrt.f32 %v87_v40  ;;  %v81_v44 = vmax.f32 %v77_v42, 0.0  ;;  %v80_v45 = vmax.f32 %v76_v43, 0.0 }
  0xab   :  { %149 = vrsqrt.f32 %v86_v41 }
  0xac   :  { %v89_v46 = vadd.f32 1e-05, %v81_v44  ;;  %v88_v47 = vadd.f32 1e-05, %v80_v45 }
  0xae   :  { %151 = vrsqrt.f32 %v89_v46 }
  0xaf   :  { %153 = vrsqrt.f32 %v88_v47 }
  0xb7   :  { %v148_v49 = vpop.eup %147 }
  0xb8   :  { %v150_v52 = vpop.eup %149  ;;  %v95_v53 = vmul.f32 %v148_v49, %v83_v48 }
  0xb9   :  { %v94_v54 = vmul.f32 %v150_v52, %v82_v50 }
  0xba   :  { %v106_v57 = vmul.f32 %v141_v51, %v95_v53 }
  0xbb   :  { %v152_v58 = vpop.eup %151  ;;  %v105_v60 = vmul.f32 %v141_v51, %v94_v54 }
  0xbc   :  { %v154_v61 = vpop.eup %153  ;;  %v97_v62 = vmul.f32 %v152_v58, %v85_v56  ;;  %v117_v63 = vadd.f32 %v142_v55, %v106_v57 }
  0xbd   :  { %v96_v1 = vmul.f32 %v154_v61, %v84_v59  ;;  %v116_v3 = vadd.f32 %v142_v55, %v105_v60 }
  0xbe   :  { %v108_v4 = vmul.f32 %v141_v51, %v97_v62  ;;  %121 = vst.msk [vmem:[#allocation5 + $0x8] sm:$0xff] %vm33_vm0, %v117_v63 }
  0xbf   :  { %v107_v5 = vmul.f32 %v141_v51, %v96_v1  ;;  %120 = vst.msk [vmem:[#allocation5] sm:$0xff] %vm33_vm0, %v116_v3 }
  0xc0   :  { %v119_v6 = vadd.f32 %v142_v55, %v108_v4 }
  0xc1   :  { %v118_v2 = vadd.f32 %v142_v55, %v107_v5 }
  0xc2   :  { %123 = vst.msk [vmem:[#allocation5 + $0x18] sm:$0xff] %vm33_vm0, %v119_v6 }
  0xc3   :  { %122 = vst.msk [vmem:[#allocation5 + $0x10] sm:$0xff] %vm33_vm0, %v118_v2 }
  0xc4   :  { %186 = shalt.err (!%p183_p9)
}
  0xc5   :  { %135 = dma.vmem_to_hbm [thread:$0]  %s130_s22, 512, %s274_s3, [#allocation4], %s200_s15, %s200_s15, %s201_s16  }
  0xc6   :  { %197 = dma.done.wait [#allocation4], 512  }
  0xc7   :  { %198 = vsyncadd [#allocation4], 4294966784 }
  0xc8   :  { %139 = vsyncpa [#allocation3], 1 }
  0xc9   :  { %140 = vsyncpa [#allocation4], 1 }

</bundles_post_ra>
